<compile_context>
chip_gen: v5e
topology: v5e:2x2
jax: 0.10.0
libtpu: 0.0.40
codegen_flags: <defaults>
</compile_context>

<pallas_src>
import functools
from typing import NamedTuple

import jax
import jax.numpy as jnp
from jax.experimental import pallas as pl
from jax.experimental.pallas import tpu as pltpu


def _round_up(x, m):
    return ((x + m - 1) // m) * m


def _vmem_capacity_bytes():
    try:
        return int(pltpu.get_tpu_info().vmem_capacity_bytes)
    except Exception:
        return 64 << 20  # conservative (v7x per-TC VMEM)


class MoeConfig(NamedTuple):
    num_experts: int          # real expert count E
    num_experts_padded: int   # E_total = num_chunks * experts_per_chunk (phantoms gated to 0)
    d_in: int
    d_out: int
    d_out_p: int              # Dout padded to a multiple of 128 lanes
    experts_per_chunk: int    # experts per grid step along the streaming axis
    experts_per_dot: int      # experts fused into one in-kernel MXU dot
    num_chunks: int           # grid extent of the expert-streaming axis


def pack_moe_params(gate_w_t, gate_b, expert_w_t, expert_b, *,
                    mxu_dtype=jnp.bfloat16,
                    max_resident_weight_bytes=None,
                    max_dot_lanes=2048,
                    stream_chunk_bytes=8 << 20,
                    force_experts_per_chunk=None,
                    force_experts_per_dot=None):
    """One-time parameter repacking. Call once at model load, NOT per forward pass.

    gate_w_t:[Din,E], gate_b:[1,E] (or [E]), expert_w_t:[E,Din,Dout], expert_b:[E,Dout]
    """
    d_in, num_experts = gate_w_t.shape
    assert expert_w_t.shape[0] == num_experts and expert_w_t.shape[1] == d_in
    d_out = expert_w_t.shape[2]

    d_out_p = max(128, _round_up(d_out, 128))
    mxu_itemsize = jnp.dtype(mxu_dtype).itemsize
    bytes_per_expert = d_in * d_out_p * mxu_itemsize

    if max_resident_weight_bytes is None:
        vmem_cap = _vmem_capacity_bytes()
        max_resident_weight_bytes = min(40 << 20, int(vmem_cap * 0.6))

    # How many experts go into one MXU dot (caps the f32 per-dot temp width).
    if force_experts_per_dot is not None:
        experts_per_dot = max(1, min(num_experts, int(force_experts_per_dot)))
    else:
        experts_per_dot = max(1, min(num_experts, max_dot_lanes // d_out_p))

    # How many experts per grid step (streaming axis); 1 chunk == fully resident weights.
    if force_experts_per_chunk is not None:
        epc = max(1, int(force_experts_per_chunk))
    elif num_experts * bytes_per_expert <= max_resident_weight_bytes:
        epc = num_experts
    else:
        epc = max(1, min(num_experts, stream_chunk_bytes // bytes_per_expert))

    experts_per_dot = min(experts_per_dot, epc)
    epc = _round_up(epc, experts_per_dot)
    num_chunks = -(-num_experts // epc)
    e_total = num_chunks * epc
    pad_e = e_total - num_experts

    # Gate path stays f32. Phantom experts get a -1e30 bias so softmax weight == 0.
    gw = jnp.pad(gate_w_t.astype(jnp.float32), ((0, 0), (0, pad_e)))
    gb = jnp.pad(jnp.reshape(gate_b, (1, num_experts)).astype(jnp.float32),
                 ((0, 0), (0, pad_e)), constant_values=-1e30)

    # Experts fused onto the N axis: [Din, E_total*DoutP], bf16 MXU operand, zero padding.
    ew = jnp.pad(expert_w_t, ((0, pad_e), (0, 0), (0, d_out_p - d_out)))
    ew = jnp.transpose(ew, (1, 0, 2)).reshape(d_in, e_total * d_out_p).astype(mxu_dtype)

    # Expert biases as an [E_total, DoutP] f32 matrix, applied as gate @ eb (tiny MXU matmul).
    eb = jnp.pad(expert_b.astype(jnp.float32), ((0, pad_e), (0, d_out_p - d_out)))

    cfg = MoeConfig(num_experts, e_total, d_in, d_out, d_out_p,
                    epc, experts_per_dot, num_chunks)
    return (gw, gb, ew, eb), cfg


def _moe_kernel(x_ref, gw_ref, gb_ref, ew_ref, eb_ref, o_ref,
                gate_sc, acc_sc, *, cfg: MoeConfig):
    j = pl.program_id(1)                      # expert-chunk index (reduction axis)
    d_out_p = cfg.d_out_p
    epd = cfg.experts_per_dot

    # --- chunk 0: gate softmax (f32, exact) + accumulator init, once per batch tile ---
    @pl.when(j == 0)
    def _():
        logits = jnp.dot(x_ref[...], gw_ref[...],
                         preferred_element_type=jnp.float32) + gb_ref[...]   # [TM, Etot]
        m = jnp.max(logits, axis=-1, keepdims=True)
        e = jnp.exp(logits - m)
        gate_sc[...] = e / jnp.sum(e, axis=-1, keepdims=True)
        acc_sc[...] = jnp.zeros_like(acc_sc)

    gate = gate_sc[...]                                   # [TM, E_total] f32
    x_mxu = x_ref[...].astype(ew_ref.dtype)               # single bf16 cast for the MXU

    if cfg.num_chunks > 1:
        lane_ids = jax.lax.broadcasted_iota(jnp.int32, gate.shape, 1)

    acc = acc_sc[...]
    n_groups = cfg.experts_per_chunk // epd
    for g in range(n_groups):
        lo = g * epd * d_out_p
        # Lane-aligned sub-dot: keeps the f32 temp to [TM, epd*DoutP] instead of the
        # full [TM, E*DoutP].
        y = jnp.dot(x_mxu, ew_ref[:, lo:lo + epd * d_out_p],
                    preferred_element_type=jnp.float32)
        for k in range(epd):
            if cfg.num_chunks == 1:
                # Static 1-lane slice of the gate, broadcast across DoutP lanes
                # (XLU lane broadcast; fine for small E).
                e_local = g * epd + k
                g_e = gate[:, e_local:e_local + 1]
            else:
                # Chunk index is dynamic -> select the gate column with a masked
                # lane-reduction (avoids a dynamic lane slice).
                e_idx = j * cfg.experts_per_chunk + g * epd + k
                g_e = jnp.sum(jnp.where(lane_ids == e_idx, gate, 0.0),
                              axis=-1, keepdims=True)
            acc = acc + g_e * y[:, k * d_out_p:(k + 1) * d_out_p]
    acc_sc[...] = acc

    # --- last chunk: fold gate-weighted expert biases via one tiny MXU matmul, store ---
    @pl.when(j == cfg.num_chunks - 1)
    def _():
        out = acc_sc[...] + jnp.dot(gate, eb_ref[...],
                                    preferred_element_type=jnp.float32)      # [TM, DoutP]
        o_ref[...] = out.astype(o_ref.dtype)


def moe_layer(x, packed_params, cfg: MoeConfig, *, tm=None, out_dtype=None):
    """x:[B, Din] -> [B, Dout]. packed_params/cfg from pack_moe_params (one-time)."""
    gw, gb, ew, eb = packed_params
    B, d_in = x.shape
    assert d_in == cfg.d_in
    # TODO(synk): on v5e, emit bf16 output (halves HBM writeback) if the consumer allows.
    out_dtype = out_dtype or x.dtype

    e_total = cfg.num_experts_padded
    chunk_lanes = cfg.experts_per_chunk * cfg.d_out_p
    vmem_cap = _vmem_capacity_bytes()

    def need_bytes(tm_):
        ew_bufs = 1 if cfg.num_chunks == 1 else 2
        return (2 * tm_ * d_in * x.dtype.itemsize                        # x tile (2 bufs)
                + 2 * tm_ * cfg.d_out_p * jnp.dtype(out_dtype).itemsize  # out tile (2 bufs)
                + ew_bufs * d_in * chunk_lanes * ew.dtype.itemsize       # expert weights
                + d_in * e_total * 4 + 512                               # gate W / b
                + e_total * cfg.d_out_p * 4                              # expert bias matrix
                + tm_ * max(e_total, 128) * 4                            # gate scratch
                + tm_ * cfg.d_out_p * 4                                  # accumulator scratch
                + 2 * tm_ * cfg.experts_per_dot * cfg.d_out_p * 4)       # per-dot f32 temp

    # Batch tile: >=16 rows (bf16 sublane packing), up to 512 to amortize per-step
    # overhead and MXU fill/drain; shrink if VMEM would be exceeded.
    if tm is None:
        tm = min(512, max(16, _round_up(B, 16)))
        while tm > 16 and need_bytes(tm) > int(vmem_cap * 0.6):
            tm //= 2

    b_pad = _round_up(B, tm)
    if b_pad != B:
        x = jnp.pad(x, ((0, b_pad - B), (0, 0)))
    grid = (b_pad // tm, cfg.num_chunks)

    need = need_bytes(tm)
    vmem_limit = max(32 << 20, need + need // 2 + (2 << 20))
    vmem_limit = min(vmem_limit, int(vmem_cap * 0.85))

    ew_reads = 1 if cfg.num_chunks == 1 else grid[0]
    cost = pl.CostEstimate(
        flops=(2 * b_pad * d_in * (e_total * cfg.d_out_p + e_total)   # expert + gate matmuls
               + 2 * b_pad * e_total * cfg.d_out_p                    # bias matmul
               + 3 * b_pad * e_total * cfg.d_out_p),                  # gated accumulate
        transcendentals=b_pad * e_total,
        bytes_accessed=(b_pad * d_in * x.dtype.itemsize
                        + ew_reads * int(ew.size) * ew.dtype.itemsize
                        + int(gw.size) * 4 + int(gb.size) * 4 + int(eb.size) * 4
                        + b_pad * cfg.d_out_p * jnp.dtype(out_dtype).itemsize),
    )

    resident = pl.Buffered(1)   # constant index_map -> one buffer is enough
    ew_pipeline = resident if cfg.num_chunks == 1 else None  # streamed -> default 2 bufs

    out = pl.pallas_call(
        functools.partial(_moe_kernel, cfg=cfg),
        out_shape=jax.ShapeDtypeStruct((b_pad, cfg.d_out_p), out_dtype),
        grid_spec=pltpu.PrefetchScalarGridSpec(
            num_scalar_prefetch=0,
            grid=grid,
            in_specs=[
                pl.BlockSpec((tm, d_in), lambda i, j: (i, 0)),                 # x tile
                pl.BlockSpec((d_in, e_total), lambda i, j: (0, 0),
                             pipeline_mode=resident),                          # gate W (f32)
                pl.BlockSpec((1, e_total), lambda i, j: (0, 0),
                             pipeline_mode=resident),                          # gate b
                pl.BlockSpec((d_in, chunk_lanes), lambda i, j: (0, j),
                             pipeline_mode=ew_pipeline),                       # expert W chunk
                pl.BlockSpec((e_total, cfg.d_out_p), lambda i, j: (0, 0),
                             pipeline_mode=resident),                          # expert bias mat
            ],
            out_specs=pl.BlockSpec((tm, cfg.d_out_p), lambda i, j: (i, 0)),
            scratch_shapes=[
                pltpu.VMEM((tm, e_total), jnp.float32),       # gate softmax
                pltpu.VMEM((tm, cfg.d_out_p), jnp.float32),   # output accumulator
            ],
        ),
        compiler_params=pltpu.CompilerParams(
            dimension_semantics=("parallel", "arbitrary"),
            vmem_limit_bytes=vmem_limit,
        ),
        cost_estimate=cost,
    )(x, gw, gb, ew, eb)

    return out[:B, :cfg.d_out]


def moe_reference(x, gate_w_t, gate_b, expert_w_t, expert_b):
    gate = jax.nn.softmax(jnp.dot(x, gate_w_t, precision="highest") + gate_b, axis=-1)
    expert_out = jnp.einsum('bd,edo->beo', x, expert_w_t, precision="highest") + expert_b
    return jnp.einsum('be,beo->bo', gate, expert_out, precision="highest")


if __name__ == "__main__":
    num_experts, in_feature, out_feature, batch = 4, 32, 32, 8

    key = jax.random.PRNGKey(0)
    kx, kgw, kgb, kew, keb = jax.random.split(key, 5)

    x = jax.random.normal(kx, (batch, in_feature), dtype=jnp.float32)
    gate_w_t = jax.random.normal(kgw, (in_feature, num_experts), dtype=jnp.float32) * 0.1
    gate_b = jax.random.normal(kgb, (1, num_experts), dtype=jnp.float32) * 0.1
    expert_w_t = jax.random.normal(kew, (num_experts, in_feature, out_feature),
                                   dtype=jnp.float32) * 0.1
    expert_b = jax.random.normal(keb, (num_experts, out_feature), dtype=jnp.float32) * 0.1

    ref = moe_reference(x, gate_w_t, gate_b, expert_w_t, expert_b)

    # 1) Resident-weight path: one fused MXU matmul over all experts per batch tile.
    params, cfg = pack_moe_params(gate_w_t, gate_b, expert_w_t, expert_b)
    out = jax.block_until_ready(moe_layer(x, params, cfg))
    assert out.shape == (batch, out_feature)
    assert jnp.allclose(out, ref, atol=1e-2, rtol=1e-2), "resident path mismatch"

    # 2) Expert-streaming path (forced small chunks): exercises the 'arbitrary' chunk
    #    grid axis, persistent gate/accumulator scratch and masked-lane gate selection.
    params_s, cfg_s = pack_moe_params(gate_w_t, gate_b, expert_w_t, expert_b,
                                      force_experts_per_chunk=2, force_experts_per_dot=1)
    out_s = jax.block_until_ready(moe_layer(x, params_s, cfg_s))
    assert jnp.allclose(out_s, ref, atol=1e-2, rtol=1e-2), "streamed path mismatch"

    # 3) Streaming with a phantom (padded) expert: E=3 does not divide the chunk size.
    e3 = 3
    ref3 = moe_reference(x, gate_w_t[:, :e3], gate_b[:, :e3], expert_w_t[:e3], expert_b[:e3])
    params3, cfg3 = pack_moe_params(gate_w_t[:, :e3], gate_b[:, :e3],
                                    expert_w_t[:e3], expert_b[:e3],
                                    force_experts_per_chunk=2, force_experts_per_dot=1)
    out3 = jax.block_until_ready(moe_layer(x, params3, cfg3))
    assert jnp.allclose(out3, ref3, atol=1e-2, rtol=1e-2), "padded-expert path mismatch"

    print("KERNEL_OK")
</pallas_src>

<mosaic_0001>
module attributes {stable_mosaic.version = 11 : i64} {
  func.func @_moe_kernel(%arg0: i32, %arg1: i32, %arg2: memref<16x32xf32, #tpu.memory_space<vmem>>, %arg3: memref<32x4xf32, #tpu.memory_space<vmem>>, %arg4: memref<1x4xf32, #tpu.memory_space<vmem>>, %arg5: memref<32x512xbf16, #tpu.memory_space<vmem>>, %arg6: memref<4x128xf32, #tpu.memory_space<vmem>>, %arg7: memref<16x128xf32, #tpu.memory_space<vmem>>, %arg8: memref<16x4xf32, #tpu.memory_space<vmem>>, %arg9: memref<16x128xf32, #tpu.memory_space<vmem>>) attributes {dimension_semantics = [#tpu.dimension_semantics<parallel>, #tpu.dimension_semantics<arbitrary>], iteration_bounds = array<i64: 1, 1>, scalar_prefetch = 0 : i64, scratch_operands = 2 : i64, tpu.core_type = #tpu.core_type<tc>, window_params = [{transform_indices = @transform_0, window_bounds = array<i64: 16, 32>}, {pipeline_mode = #tpu.pipeline_mode<synchronous>, transform_indices = @transform_1, window_bounds = array<i64: 32, 4>}, {pipeline_mode = #tpu.pipeline_mode<synchronous>, transform_indices = @transform_2, window_bounds = array<i64: 1, 4>}, {pipeline_mode = #tpu.pipeline_mode<synchronous>, transform_indices = @transform_3, window_bounds = array<i64: 32, 512>}, {pipeline_mode = #tpu.pipeline_mode<synchronous>, transform_indices = @transform_4, window_bounds = array<i64: 4, 128>}, {transform_indices = @transform_5, window_bounds = array<i64: 16, 128>}]} {
    %c0_i32 = arith.constant 0 : i32
    %0 = arith.cmpi eq, %arg1, %c0_i32 : i32
    %1 = arith.extui %0 : i1 to i32
    %c0_i32_0 = arith.constant 0 : i32
    %2 = arith.cmpi ne, %1, %c0_i32_0 : i32
    scf.if %2 {
      %c0_12 = arith.constant 0 : index
      %c0_13 = arith.constant 0 : index
      %33 = vector.load %arg2[%c0_12, %c0_13] : memref<16x32xf32, #tpu.memory_space<vmem>>, vector<16x32xf32>
      %c0_14 = arith.constant 0 : index
      %c0_15 = arith.constant 0 : index
      %34 = vector.load %arg3[%c0_14, %c0_15] : memref<32x4xf32, #tpu.memory_space<vmem>>, vector<32x4xf32>
      %cst_16 = arith.constant dense<0.000000e+00> : vector<16x4xf32>
      %35 = tpu.matmul %33, %34, %cst_16 {dimension_numbers = #tpu.dot_dimension_numbers<[1], [0], [0], [1], [0, 0, 1, 1], [], []>} : vector<16x32xf32>, vector<32x4xf32>, vector<16x4xf32> -> vector<16x4xf32>
      %c0_17 = arith.constant 0 : index
      %c0_18 = arith.constant 0 : index
      %36 = vector.load %arg4[%c0_17, %c0_18] : memref<1x4xf32, #tpu.memory_space<vmem>>, vector<1x4xf32>
      %37 = vector.broadcast %36 : vector<1x4xf32> to vector<16x4xf32>
      %38 = arith.addf %35, %37 : vector<16x4xf32>
      %cst_19 = arith.constant dense<0xFF800000> : vector<16xf32>
      %39 = vector.multi_reduction <maximumf>, %38, %cst_19 [1] : vector<16x4xf32> to vector<16xf32>
      %40 = vector.shape_cast %39 : vector<16xf32> to vector<16x1xf32>
      %41 = vector.broadcast %40 : vector<16x1xf32> to vector<16x4xf32>
      %42 = arith.subf %38, %41 : vector<16x4xf32>
      %43 = math.exp %42 : vector<16x4xf32>
      %cst_20 = arith.constant dense<0.000000e+00> : vector<16xf32>
      %44 = vector.multi_reduction <add>, %43, %cst_20 [1] : vector<16x4xf32> to vector<16xf32>
      %45 = vector.shape_cast %44 : vector<16xf32> to vector<16x1xf32>
      %46 = vector.broadcast %45 : vector<16x1xf32> to vector<16x4xf32>
      %47 = arith.divf %43, %46 : vector<16x4xf32>
      %c0_21 = arith.constant 0 : index
      %c0_22 = arith.constant 0 : index
      %48 = vector.load %arg8[%c0_21, %c0_22] : memref<16x4xf32, #tpu.memory_space<vmem>>, vector<16x4xf32>
      tpu.vector_store %arg8[%c0_21, %c0_22], %47 {strides = array<i32>} : memref<16x4xf32, #tpu.memory_space<vmem>>, vector<16x4xf32>,
      %cst_23 = arith.constant 0.000000e+00 : f32
      %49 = vector.broadcast %cst_23 : f32 to vector<16x128xf32>
      %c0_24 = arith.constant 0 : index
      %c0_25 = arith.constant 0 : index
      %50 = vector.load %arg9[%c0_24, %c0_25] : memref<16x128xf32, #tpu.memory_space<vmem>>, vector<16x128xf32>
      tpu.vector_store %arg9[%c0_24, %c0_25], %49 {strides = array<i32>} : memref<16x128xf32, #tpu.memory_space<vmem>>, vector<16x128xf32>,
    } else {
    }
    %c0 = arith.constant 0 : index
    %c0_1 = arith.constant 0 : index
    %3 = vector.load %arg8[%c0, %c0_1] : memref<16x4xf32, #tpu.memory_space<vmem>>, vector<16x4xf32>
    %c0_2 = arith.constant 0 : index
    %c0_3 = arith.constant 0 : index
    %4 = vector.load %arg2[%c0_2, %c0_3] : memref<16x32xf32, #tpu.memory_space<vmem>>, vector<16x32xf32>
    %5 = arith.truncf %4 : vector<16x32xf32> to vector<16x32xbf16>
    %c0_4 = arith.constant 0 : index
    %c0_5 = arith.constant 0 : index
    %6 = vector.load %arg9[%c0_4, %c0_5] : memref<16x128xf32, #tpu.memory_space<vmem>>, vector<16x128xf32>
    %c0_6 = arith.constant 0 : index
    %c0_7 = arith.constant 0 : index
    %7 = vector.load %arg5[%c0_6, %c0_7] : memref<32x512xbf16, #tpu.memory_space<vmem>>, vector<32x512xbf16>
    %cst = arith.constant dense<0.000000e+00> : vector<16x512xf32>
    %8 = tpu.matmul %5, %7, %cst {dimension_numbers = #tpu.dot_dimension_numbers<[1], [0], [0], [1], [0, 0, 1, 1], [], []>} : vector<16x32xbf16>, vector<32x512xbf16>, vector<16x512xf32> -> vector<16x512xf32>
    %9 = vector.extract_strided_slice %3 {offsets = [0, 0], sizes = [16, 1], strides = [1, 1]} : vector<16x4xf32> to vector<16x1xf32>
    %10 = vector.extract_strided_slice %8 {offsets = [0, 0], sizes = [16, 128], strides = [1, 1]} : vector<16x512xf32> to vector<16x128xf32>
    %11 = vector.broadcast %9 : vector<16x1xf32> to vector<16x128xf32>
    %12 = arith.mulf %11, %10 : vector<16x128xf32>
    %13 = arith.addf %6, %12 : vector<16x128xf32>
    %14 = vector.extract_strided_slice %3 {offsets = [0, 1], sizes = [16, 1], strides = [1, 1]} : vector<16x4xf32> to vector<16x1xf32>
    %15 = vector.extract_strided_slice %8 {offsets = [0, 128], sizes = [16, 128], strides = [1, 1]} : vector<16x512xf32> to vector<16x128xf32>
    %16 = vector.broadcast %14 : vector<16x1xf32> to vector<16x128xf32>
    %17 = arith.mulf %16, %15 : vector<16x128xf32>
    %18 = arith.addf %13, %17 : vector<16x128xf32>
    %19 = vector.extract_strided_slice %3 {offsets = [0, 2], sizes = [16, 1], strides = [1, 1]} : vector<16x4xf32> to vector<16x1xf32>
    %20 = vector.extract_strided_slice %8 {offsets = [0, 256], sizes = [16, 128], strides = [1, 1]} : vector<16x512xf32> to vector<16x128xf32>
    %21 = vector.broadcast %19 : vector<16x1xf32> to vector<16x128xf32>
    %22 = arith.mulf %21, %20 : vector<16x128xf32>
    %23 = arith.addf %18, %22 : vector<16x128xf32>
    %24 = vector.extract_strided_slice %3 {offsets = [0, 3], sizes = [16, 1], strides = [1, 1]} : vector<16x4xf32> to vector<16x1xf32>
    %25 = vector.extract_strided_slice %8 {offsets = [0, 384], sizes = [16, 128], strides = [1, 1]} : vector<16x512xf32> to vector<16x128xf32>
    %26 = vector.broadcast %24 : vector<16x1xf32> to vector<16x128xf32>
    %27 = arith.mulf %26, %25 : vector<16x128xf32>
    %28 = arith.addf %23, %27 : vector<16x128xf32>
    %c0_8 = arith.constant 0 : index
    %c0_9 = arith.constant 0 : index
    %29 = vector.load %arg9[%c0_8, %c0_9] : memref<16x128xf32, #tpu.memory_space<vmem>>, vector<16x128xf32>
    tpu.vector_store %arg9[%c0_8, %c0_9], %28 {strides = array<i32>} : memref<16x128xf32, #tpu.memory_space<vmem>>, vector<16x128xf32>,
    %c0_i32_10 = arith.constant 0 : i32
    %30 = arith.cmpi eq, %arg1, %c0_i32_10 : i32
    %31 = arith.extui %30 : i1 to i32
    %c0_i32_11 = arith.constant 0 : i32
    %32 = arith.cmpi ne, %31, %c0_i32_11 : i32
    scf.if %32 {
      %c0_12 = arith.constant 0 : index
      %c0_13 = arith.constant 0 : index
      %33 = vector.load %arg9[%c0_12, %c0_13] : memref<16x128xf32, #tpu.memory_space<vmem>>, vector<16x128xf32>
      %c0_14 = arith.constant 0 : index
      %c0_15 = arith.constant 0 : index
      %34 = vector.load %arg6[%c0_14, %c0_15] : memref<4x128xf32, #tpu.memory_space<vmem>>, vector<4x128xf32>
      %cst_16 = arith.constant dense<0.000000e+00> : vector<16x128xf32>
      %35 = tpu.matmul %3, %34, %cst_16 {dimension_numbers = #tpu.dot_dimension_numbers<[1], [0], [0], [1], [0, 0, 1, 1], [], []>} : vector<16x4xf32>, vector<4x128xf32>, vector<16x128xf32> -> vector<16x128xf32>
      %36 = arith.addf %33, %35 : vector<16x128xf32>
      %c0_17 = arith.constant 0 : index
      %c0_18 = arith.constant 0 : index
      %37 = vector.load %arg7[%c0_17, %c0_18] : memref<16x128xf32, #tpu.memory_space<vmem>>, vector<16x128xf32>
      tpu.vector_store %arg7[%c0_17, %c0_18], %36 {strides = array<i32>} : memref<16x128xf32, #tpu.memory_space<vmem>>, vector<16x128xf32>,
    } else {
    }
    return
  }
  func.func @transform_0(%arg0: i32, %arg1: i32) -> (i32, i32) {
    %c0_i32 = arith.constant 0 : i32
    %c0_i32_0 = arith.constant 0 : i32
    return %arg0, %c0_i32 : i32, i32
  }
  func.func @transform_1(%arg0: i32, %arg1: i32) -> (i32, i32) {
    %c0_i32 = arith.constant 0 : i32
    %c0_i32_0 = arith.constant 0 : i32
    %c0_i32_1 = arith.constant 0 : i32
    return %c0_i32, %c0_i32_0 : i32, i32
  }
  func.func @transform_2(%arg0: i32, %arg1: i32) -> (i32, i32) {
    %c0_i32 = arith.constant 0 : i32
    %c0_i32_0 = arith.constant 0 : i32
    %c0_i32_1 = arith.constant 0 : i32
    return %c0_i32, %c0_i32_0 : i32, i32
  }
  func.func @transform_3(%arg0: i32, %arg1: i32) -> (i32, i32) {
    %c0_i32 = arith.constant 0 : i32
    %c0_i32_0 = arith.constant 0 : i32
    return %c0_i32, %arg1 : i32, i32
  }
  func.func @transform_4(%arg0: i32, %arg1: i32) -> (i32, i32) {
    %c0_i32 = arith.constant 0 : i32
    %c0_i32_0 = arith.constant 0 : i32
    %c0_i32_1 = arith.constant 0 : i32
    return %c0_i32, %c0_i32_0 : i32, i32
  }
  func.func @transform_5(%arg0: i32, %arg1: i32) -> (i32, i32) {
    %c0_i32 = arith.constant 0 : i32
    %c0_i32_0 = arith.constant 0 : i32
    return %arg0, %c0_i32 : i32, i32
  }
}

</mosaic_0001>

<bundles_post_ra>
// kernel: tpu_custom_call.1
= control target key start
LH: loop header
LB: loop body
LE: loop exit
PB: predicated region body
PF: predicated region fallthrough
CT: control target
= control target key end

     0   :  { %10 = vsyncpa [#allocation5], 0  ;;  %s584_s0 = inlined_call_operand.vmem [shape: f32[16,32], index: 0, kind: input, shape index: {}]   ;;  %s585_s1 = inlined_call_operand.vmem [shape: f32[32,4], index: 1, kind: input, shape index: {}]   ;;  %s586_s2 = inlined_call_operand.vmem [shape: f32[1,4], index: 2, kind: input, shape index: {}]   ;;  %s587_s3 = inlined_call_operand.hbm [shape: bf16[32,512], index: 3, kind: input, shape index: {}]   ;;  %s588_s4 = inlined_call_operand.vmem [shape: f32[4,128], index: 4, kind: input, shape index: {}]   ;;  %s589_s5 = inlined_call_operand.hbm [shape: f32[16,128], index: 5, kind: output, shape index: {}]  }
   0x1   :  { %11 = vsyncpa [#allocation6], 0  ;;  %s22_s20 = sshll.u32 %s587_s3, 4  ;;  %s496_s21 = smov [#allocation4]   ;;  %s23_s20 = int_to_ptr.hbm [resolvable:$true] %s22_s20 }
   0x2   :  { %s24_s22 = sshll.u32 %s496_s21, 4  ;;  %s497_s23 = smov 256   ;;  %s25_s22 = int_to_ptr.vmem [resolvable:$true] %s24_s22 }
   0x3   :  { %s498_s24 = smov 16  }
   0x4   :  { %30 = dma.hbm_to_vmem [thread:$0]  %s23_s20, 1024, %s25_s22, [#allocation5], %s497_s23, %s497_s23, %s498_s24  }
   0x5   :  { %492 = dma.done.wait [#allocation5], 1024  }
   0x6   :  { %493 = vsyncadd [#allocation5], 4294966272  ;;  %v47_v0 = vld [vmem:[%s585_s1 + $0x18] sm:$0xff]  ;;  %v46_v1 = vld [vmem:[%s585_s1 + $0x10] sm:$0xff]  ;;  %vm52_vm0 = vcmask 261120   ;;  %vm82_vm1 = vcmask 31744  }
   0x7   :  { %412 = vmatpush.msra.mxu2 %v47_v0  ;;  %71 = vmatpush.msra.mxu0 %v47_v0  ;;  %v45_v2 = vld [vmem:[%s585_s1 + $0x8] sm:$0xff]  ;;  %v44_v3 = vld [vmem:[%s585_s1] sm:$0xff]  ;;  %v383_v13 = vld [vmem:[#allocation4 + $0x20] sm:$0xf]  ;;  %vm313_vm2 = vcmask 1043456   ;;  %v499_v49 = vmov 1  }
   0x8   :  { %v43_v4 = vld [vmem:[%s584_s0 + $0x8] sm:$0xff]  ;;  %v42_v5 = vld [vmem:[%s584_s0] sm:$0xff]  ;;  %v408_v15 = vld [vmem:[#allocation4 + $0x24] sm:$0xf]  ;;  %429 = vset.pattern.permute.xlu1 %v499_v49  ;;  %428 = vset.pattern.permute.xlu0 %v499_v49  ;;  %v500_v50 = vmov 0   ;;  %s350_s15 = sshll.u32 %s589_s5, 4  ;;  %s351_s15 = int_to_ptr.hbm [resolvable:$true] %s350_s15 }
   0x9   :  { %413 = vmatpush.msra.mxu2 %v46_v1  ;;  %72 = vmatpush.msra.mxu0 %v46_v1  ;;  %v435_v6 = vld [vmem:[%s586_s2] ss:$0 sm:$0xff]  ;;  %v385_v17 = vld [vmem:[#allocation4 + $0x30] sm:$0xf0]  ;;  %v367_v18 = vld [vmem:[#allocation4] sm:$0xf]  ;;  %v139_v35 = vpack.c.bf16 %v43_v4, %v42_v5 }
   0xa   :  { %v410_v14 = vld [vmem:[#allocation4 + $0x2c] sm:$0xf0]  ;;  %v388_v20 = vor.u32 %v408_v15, %v385_v17  ;;  %v404_v21 = vld [vmem:[#allocation4 + $0x4] sm:$0xf]  ;;  %v369_v22 = vld [vmem:[#allocation4 + $0x10] sm:$0xf0]  ;;  %427 = vset.pattern.permute.xlu2 %v500_v50 }
   0xb   :  { %414 = vmatpush.msra.mxu2 %v45_v2  ;;  %73 = vmatpush.msra.mxu0 %v45_v2  ;;  %v384_v16 = vor.u32 %v410_v14, %v383_v13  ;;  %v406_v19 = vld [vmem:[#allocation4 + $0xc] sm:$0xf0]  ;;  %v372_v24 = vor.u32 %v404_v21, %v369_v22  ;;  %v391_v36 = vld [vmem:[#allocation4 + $0x28] sm:$0xf]  ;;  %v411_v37 = vld [vmem:[#allocation4 + $0x34] sm:$0xf0] }
   0xc   :  { %v368_v23 = vor.u32 %v406_v19, %v367_v18  ;;  %v392_v38 = vor.u32 %v411_v37, %v391_v36  ;;  %v375_v39 = vld [vmem:[#allocation4 + $0x8] sm:$0xf]  ;;  %v407_v40 = vld [vmem:[#allocation4 + $0x14] sm:$0xf0]  ;;  %v409_v42 = vld [vmem:[#allocation4 + $0x2c] sm:$0xf] }
   0xd   :  { %415 = vmatpush.msra.mxu2 %v44_v3  ;;  %74 = vmatpush.msra.mxu0 %v44_v3  ;;  %v376_v41 = vor.u32 %v407_v40, %v375_v39  ;;  %v393_v43 = vld [vmem:[#allocation4 + $0x38] sm:$0xf0]  ;;  %v405_v45 = vld [vmem:[#allocation4 + $0xc] sm:$0xf]  ;;  %v307_v48 = vld [vmem:[%s588_s4] sm:$0xf] }
   0xe   :  { %364 = vmatmul.msk.f32.vlgmr.msra.gmra.mxu2 %vm52_vm0, %v43_v4  ;;  %363 = vmatmul.msk.f32.vlgmr.msra.gmra.mxu0 %vm52_vm0, %v42_v5  ;;  %v396_v44 = vor.u32 %v409_v42, %v393_v43  ;;  %v377_v46 = vld [vmem:[#allocation4 + $0x18] sm:$0xf0]  ;;  %v501_v13 = vmov 3   ;;  %v502_v14 = vmov 2   ;;  %s503_s2 = smov [#allocation7]   ;;  %s504_s16 = smov 128  }
   0xf   :  { %200 = vmatpush.bf16.msra.mxu1 %v384_v16  ;;  %214 = vmatpush.bf16.msrb.mxu2 %v388_v20  ;;  %v380_v47 = vor.u32 %v405_v45, %v377_v46  ;;  %s348_s4 = sshll.u32 %s503_s2, 4  ;;  %s505_s17 = smov 8   ;;  %s349_s4 = int_to_ptr.vmem [resolvable:$true] %s348_s4 }
  0x10   :  { %228 = vmatpush.bf16.msra.mxu3 %v392_v38  ;;  %242 = vmatpush.bf16.msrb.mxu0 %v396_v44 }
  0x13   :  { %201 = vmatpush.bf16.msra.mxu1 %v368_v23  ;;  %215 = vmatpush.bf16.msrb.mxu2 %v372_v24 }
  0x14   :  { %229 = vmatpush.bf16.msra.mxu3 %v376_v41  ;;  %243 = vmatpush.bf16.msrb.mxu0 %v380_v47 }
  0x16   :  { %397 = vmatmul.msk.bf16.vlgmr.msra.gmra.mxu1 %vm52_vm0, %v139_v35  ;;  %398 = vmatmul.msk.bf16.vlgmr.msrb.gmra.mxu2 %vm52_vm0, %v139_v35 }
  0x17   :  { %399 = vmatmul.msk.bf16.vlgmr.msra.gmra.mxu3 %vm52_vm0, %v139_v35  ;;  %400 = vmatmul.msk.bf16.vlgmr.msrb.gmra.mxu0 %vm52_vm0, %v139_v35 }
  0x18   :  { %416 = vmatpush.msk.msrb.mxu3 %vm313_vm2, %v307_v48  ;;  %401 = vmatpush.msk.msrb.mxu1 %vm313_vm2, %v307_v48 }
  0x8b   :  { %v76_v9 = vpop.f32.mrf.mxu0 }
  0x8c   :  { %v77_v11 = vadd.f32 %v435_v6, %v76_v9 }
  0x8e   :  { %v83_v12 = vsel %vm82_vm1, %v77_v11, -inf }
  0x91   :  { %v79_v7 = vpop.f32.mrf.mxu2 }
  0x92   :  { %v80_v8 = vadd.f32 %v435_v6, %v79_v7 }
  0x93   :  { %v203_v18 = vpop.f32.mrf.mxu1 }
  0x94   :  { %v86_v10 = vsel %vm82_vm1, %v80_v8, -inf }
  0x95   :  { %87 = vmax.xlane.f32.xlu0 %v86_v10 }
  0x99   :  { %v217_v19 = vpop.f32.mrf.mxu2 }
  0x9a   :  { %v231_v23 = vpop.f32.mrf.mxu3 }
  0x9d   :  { %84 = vmax.xlane.f32.xlu0 %v83_v12 }
  0xa2   :  { %v233_v37 = vpop.f32.mrf.mxu3 }
 0x108   :  { %v88_v25 = vpop.xlane.xlu0 %87 }
 0x109   :  { %v90_v26 = vsub.f32 %v80_v8, %v88_v25 }
 0x10b   :  { %v93_v27 = vmul.f32 1.442695, %v90_v26  ;;  %v205_v26 = vpop.f32.mrf.mxu1 }
 0x10d   :  { %436 = vpow2.f32 %v93_v27 }
 0x110   :  { %v85_v28 = vpop.xlane.xlu0 %84 }
 0x111   :  { %v89_v29 = vsub.f32 %v77_v11, %v85_v28  ;;  %v245_v28 = vpop.f32.mrf.mxu0 }
 0x113   :  { %v437_v30 = vpop.eup %436  ;;  %v91_v31 = vmul.f32 1.442695, %v89_v29 }
 0x114   :  { %v98_v32 = vsel %vm82_vm1, %v437_v30, 0.0 }
 0x115   :  { %438 = vpow2.f32 %v91_v31  ;;  %99 = vadd.xlane.f32.xlu1 %v98_v32  ;;  %v219_v31 = vpop.f32.mrf.mxu2 }
 0x119   :  { %v247_v42 = vpop.f32.mrf.mxu0 }
 0x11b   :  { %v565_v33 = vpop.eup %438 }
 0x11c   :  { %v95_v34 = vsel %vm82_vm1, %v565_v33, 0.0 }
 0x11d   :  { %96 = vadd.xlane.f32.xlu1 %v95_v34 }
 0x188   :  { %v100_v51 = vpop.xlane.xlu1 %99 }
 0x189   :  { %440 = vrcp.f32 %v100_v51  ;;  %v127_v56 = vand.u32 2147483648, %v100_v51  ;;  %v125_v58 = vand.u32 2147483647, %v100_v51  ;;  %vm121_vm4 = vweird.f32 %v100_v51 }
 0x18b   :  { %v128_v61 = vor.u32 1.1754944e-38, %v127_v56  ;;  %vm126_vm6 = vcmp.eq.f32.partialorder %v125_v58, 8.507059e+37 }
 0x18f   :  { %v441_v52 = vpop.eup %440 }
 0x190   :  { %v117_v53 = vmul.f32 %v441_v52, %v100_v51  ;;  %v97_v54 = vpop.xlane.xlu1 %96  ;;  %vm122_vm3 = vweird.f32 %v441_v52 }
 0x191   :  { %442 = vrcp.f32 %v97_v54  ;;  %vm123_vm5 = vmor %vm121_vm4, %vm122_vm3  ;;  %v112_v3 = vand.u32 2147483648, %v97_v54  ;;  %v110_v5 = vand.u32 2147483647, %v97_v54  ;;  %vm106_vm8 = vweird.f32 %v97_v54 }
 0x192   :  { %v118_v55 = vsub.f32 1.0, %v117_v53 }
 0x193   :  { %v113_v7 = vor.u32 1.1754944e-38, %v112_v3  ;;  %vm111_vm10 = vcmp.eq.f32.partialorder %v110_v5, 8.507059e+37 }
 0x194   :  { %v119_v57 = vmul.f32 %v441_v52, %v118_v55 }
 0x196   :  { %v120_v59 = vadd.f32 %v441_v52, %v119_v57 }
 0x197   :  { %v443_v60 = vpop.eup %442 }
 0x198   :  { %v124_v62 = vsel %vm123_vm5, %v441_v52, %v120_v59  ;;  %v102_v63 = vmul.f32 %v443_v60, %v97_v54  ;;  %vm107_vm7 = vweird.f32 %v443_v60 }
 0x199   :  { %v129_v0 = vsel %vm126_vm6, %v128_v61, %v124_v62  ;;  %vm108_vm9 = vmor %vm106_vm8, %vm107_vm7 }
 0x19a   :  { %v130_v1 = vmul.f32 %v437_v30, %v129_v0  ;;  %v103_v2 = vsub.f32 1.0, %v102_v63 }
 0x19c   :  { %132 = vst.msk [vmem:[#allocation2 + $0x8] sm:$0xff] %vm82_vm1, %v130_v1  ;;  %v104_v4 = vmul.f32 %v443_v60, %v103_v2 }
 0x19e   :  { %v105_v6 = vadd.f32 %v443_v60, %v104_v4 }
 0x1a0   :  { %v109_v8 = vsel %vm108_vm9, %v443_v60, %v105_v6 }
 0x1a1   :  { %v114_v9 = vsel %vm111_vm10, %v113_v7, %v109_v8 }
 0x1a2   :  { %v115_v10 = vmul.f32 %v565_v33, %v114_v9 }
 0x1a3   :  { %v136_v11 = vld [vmem:[#allocation2 + $0x8] sm:$0xff] }
 0x1a4   :  { %131 = vst.msk [vmem:[#allocation2] sm:$0xff] %vm82_vm1, %v115_v10  ;;  %403 = vmatmul.msk.f32.vlgmr.msrb.gmra.mxu3 %vm82_vm1, %v136_v11  ;;  %269 = vperm.xlu1 %429, %v136_v11  }
 0x1ab   :  { %v135_v12 = vld [vmem:[#allocation2] sm:$0xff] }
 0x1ac   :  { %265 = vperm.xlu0 %428, %v135_v12   ;;  %252 = vperm.xlu2 %427, %v135_v12  }
 0x1ad   :  { %402 = vmatmul.msk.f32.vlgmr.msrb.gmra.mxu1 %vm82_vm1, %v135_v12 }
 0x1b4   :  { %257 = vperm.xlu2 %427, %v136_v11   ;;  %434 = vset.pattern.permute.xlu0 %v501_v13 }
 0x1bc   :  { %430 = vset.pattern.permute.xlu2 %v502_v14 }
 0x1bd   :  { %277 = vperm.xlu2 %430, %v135_v12  }
 0x1c5   :  { %431 = vset.pattern.permute.xlu2 %v501_v13 }
 0x1c6   :  { %289 = vperm.xlu2 %431, %v135_v12  }
 0x1ce   :  { %432 = vset.pattern.permute.xlu2 %v502_v14 }
 0x1cf   :  { %281 = vperm.xlu2 %432, %v136_v11  }
 0x1d7   :  { %433 = vset.pattern.permute.xlu2 %v501_v13 }
 0x1d8   :  { %293 = vperm.xlu2 %433, %v136_v11  }
 0x206   :  { %v253_v15 = vpop.permute.xlu2 %252 }
 0x207   :  { %v260_v21 = vmul.f32 %v253_v15, %v203_v18 }
 0x20e   :  { %v258_v16 = vpop.permute.xlu2 %257 }
 0x20f   :  { %v261_v39 = vmul.f32 %v258_v16, %v205_v26 }
 0x216   :  { %v270_v34 = vpop.permute.xlu1 %269 }
 0x217   :  { %v278_v17 = vpop.permute.xlu2 %277  ;;  %v273_v38 = vmul.f32 %v270_v34, %v219_v31 }
 0x218   :  { %v284_v27 = vmul.f32 %v278_v17, %v231_v23 }
 0x219   :  { %v275_v41 = vadd.f32 %v273_v38, %v261_v39 }
 0x21e   :  { %v266_v20 = vpop.permute.xlu0 %265 }
 0x21f   :  { %v272_v22 = vmul.f32 %v266_v20, %v217_v19 }
 0x220   :  { %v290_v24 = vpop.permute.xlu2 %289 }
 0x221   :  { %v274_v25 = vadd.f32 %v272_v22, %v260_v21  ;;  %v296_v30 = vmul.f32 %v290_v24, %v245_v28 }
 0x223   :  { %v286_v29 = vadd.f32 %v284_v27, %v274_v25 }
 0x225   :  { %v298_v33 = vadd.f32 %v296_v30, %v286_v29 }
 0x227   :  { %v337_v47 = vpop.f32.mrf.mxu3 }
 0x229   :  { %v282_v32 = vpop.permute.xlu2 %281 }
 0x22a   :  { %v334_v35 = vpop.f32.mrf.mxu1  ;;  %v285_v40 = vmul.f32 %v282_v32, %v233_v37 }
 0x22b   :  { %v340_v36 = vadd.f32 %v334_v35, %v298_v33 }
 0x22c   :  { %v287_v44 = vadd.f32 %v285_v40, %v275_v41 }
 0x22d   :  { %342 = vst [vmem:[#allocation7] sm:$0xff] %v340_v36 }
 0x232   :  { %v294_v43 = vpop.permute.xlu2 %293 }
 0x233   :  { %v297_v45 = vmul.f32 %v294_v43, %v247_v42 }
 0x235   :  { %v299_v46 = vadd.f32 %v297_v45, %v287_v44 }
 0x237   :  { %v341_v48 = vadd.f32 %v337_v47, %v299_v46 }
 0x239   :  { %343 = vst [vmem:[#allocation7 + $0x8] sm:$0xff] %v341_v48 }
 0x23a   :  { %356 = dma.vmem_to_hbm [thread:$0]  %s349_s4, 256, %s351_s15, [#allocation6], %s504_s16, %s504_s16, %s505_s17  }
 0x23b   :  { %494 = dma.done.wait [#allocation6], 256  }
 0x23c   :  { %495 = vsyncadd [#allocation6], 4294967040 }
 0x23d   :  { %361 = vsyncpa [#allocation5], 1 }
 0x23e   :  { %362 = vsyncpa [#allocation6], 1 }

</bundles_post_ra>
